<compile_context>
chip_gen: v7x
topology: tpu7x:2x2x1
jax: 0.10.0
libtpu: 0.0.40
codegen_flags: <defaults>
</compile_context>

<pallas_src>
import math

import jax
import jax.numpy as jnp
from jax.experimental import pallas as pl
from jax.experimental.pallas import tpu as pltpu


# ---------------------------------------------------------------------------
# Kernel
# ---------------------------------------------------------------------------
def _recourse_add_kernel(x_ref, a_ref, o_ref):
    # x_ref: (TB, TW) batch tile in its native dtype.
    # a_ref: (1, TW) action tile in its native dtype (broadcast over batch).
    # o_ref: (TB, TW) output tile in the promoted dtype.
    # Casting inside the kernel avoids a separate widening pass over x in HBM
    # when dtypes are mixed; the VPU cast rides along with the add for free.
    o_ref[...] = x_ref[...].astype(o_ref.dtype) + a_ref[...].astype(o_ref.dtype)


# ---------------------------------------------------------------------------
# Hardware / tiling helpers
# ---------------------------------------------------------------------------
def _vmem_limit_bytes() -> int:
    """Generation-aware scoped-VMEM limit (passed explicitly to Mosaic)."""
    cap = 64 << 20  # conservative default == v7x physical per-TC VMEM
    try:
        info = pltpu.get_tpu_info()
        cap = int(getattr(info, "vmem_capacity_bytes", cap)) or cap
    except Exception:
        pass
    # Half of physical, capped at 48 MiB, floored at 16 MiB: ample headroom
    # for Mosaic internal scratch on v5e/v6e (128 MiB phys) and v7x (64 MiB).
    return max(16 << 20, min(cap // 2, 48 << 20))


# ---------------------------------------------------------------------------
# Forward wrapper
# ---------------------------------------------------------------------------
def recourse_forward(x: jax.Array, action: jax.Array, *,
                     force_pallas: bool = False,
                     donate_x: bool = False,
                     small_bytes_threshold: int = 4 << 20):
    """x: [B, F], action: [F] -> (x + action, cost) with cost == action."""
    assert x.ndim == 2 and action.ndim == 1 and x.shape[1] == action.shape[0]
    B, F = x.shape
    out_dtype = jnp.result_type(x.dtype, action.dtype)

    # cost = deepcopy(action): JAX arrays are immutable, return action as-is.
    cost = action

    out_bytes = B * F * jnp.dtype(out_dtype).itemsize
    if (not force_pallas) and out_bytes <= small_bytes_threshold:
        # Tiny problem: pallas_call launch overhead dominates; XLA's fused
        # broadcast-add already hits the HBM roofline.
        return x.astype(out_dtype) + action.astype(out_dtype), cost

    x_item = jnp.dtype(x.dtype).itemsize
    o_item = jnp.dtype(out_dtype).itemsize

    # ---- Lane-dense view: fold k rows so the lane axis is a multiple of 128.
    if F % 128 == 0:
        k = 1
    else:
        k = 128 // math.gcd(F, 128)
        if B % k != 0:
            k = 0  # folding impossible for this (B, F); use natural layout
    if k:
        b_eff, w = B // k, F * k
        a_row = action if k == 1 else jnp.tile(action, (k,))
    else:
        # Natural layout: only the store path is masked when F % 128 != 0.
        # (Padding B to a multiple of k would cost 2-3 extra HBM passes.)
        b_eff, w = B, F
        a_row = action
    x2 = x.reshape(b_eff, w)            # contiguous reshape: free
    a2 = a_row.reshape(1, w)

    # ---- VMEM-aware tile sizing (double-buffered x + out per grid step).
    vmem_limit = _vmem_limit_bytes()
    slack = 4 << 20                                    # action bufs + scratch
    bytes_per_elem = 2 * (x_item + o_item)             # 2 bufs in + 2 bufs out
    tile_elems = max(1, (vmem_limit - slack) // bytes_per_elem)
    tile_elems = min(tile_elems, (8 << 20) // o_item)  # <= ~8 MiB per buffer
    # dtype-aware sublane multiple: 8 (f32), 16 (bf16/f16), 32 (int8/fp8)
    sub = max(8, 32 // min(x_item, o_item))
    tile_elems = max(tile_elems, sub * 128)

    # Width (lane) tiling so arbitrarily wide F never blows VMEM.
    if w <= 128 or sub * w <= tile_elems:
        tw = w
    else:
        tw = min(w, max(128, (tile_elems // sub) // 128 * 128))
    # Batch (sublane) tiling.
    tb = max(sub, (tile_elems // tw) // sub * sub)
    tb = min(tb, b_eff)

    # Single-tile problems: split into >= 2 batch tiles so the "parallel"
    # axis can shard across both TensorCores on v7x (no-op on v5e/v6e).
    if pl.cdiv(b_eff, tb) * pl.cdiv(w, tw) == 1 and b_eff >= 2 * sub:
        tb_split = ((b_eff + 1) // 2 + sub - 1) // sub * sub
        if tb_split < b_eff:
            tb = tb_split

    grid = (pl.cdiv(b_eff, tb), pl.cdiv(w, tw))

    io_aliases = {}
    if donate_x and x.dtype == out_dtype:
        io_aliases = {0: 0}  # reuse x's buffer for the output (caller donates)

    x_out2 = pl.pallas_call(
        _recourse_add_kernel,
        out_shape=jax.ShapeDtypeStruct((b_eff, w), out_dtype),
        grid=grid,
        in_specs=[
            pl.BlockSpec((tb, tw), lambda i, j: (i, j)),   # streamed x tile
            pl.BlockSpec((1, tw), lambda i, j: (0, j)),    # tiny action tile
            # TODO(synk): pipeline_mode=pl.Buffered(1) on the action spec
            # would drop its redundant second buffer; omitted for compile
            # safety and covered by the VMEM slack instead.
        ],
        out_specs=pl.BlockSpec((tb, tw), lambda i, j: (i, j)),
        compiler_params=pltpu.CompilerParams(
            dimension_semantics=("parallel", "parallel"),  # megacore on v7x
            vmem_limit_bytes=vmem_limit,
        ),
        input_output_aliases=io_aliases,
    )(x2, a2)

    return x_out2.reshape(B, F), cost


# ---------------------------------------------------------------------------
# Demo / correctness check
# ---------------------------------------------------------------------------
if __name__ == "__main__":
    key = jax.random.PRNGKey(0)
    kx, ka, kx2, kx3 = jax.random.split(key, 4)

    # Small shape consistent with the module (batch=2, hidden=32).
    B, F = 2, 32
    x = jax.random.normal(kx, (B, F), dtype=jnp.float32)
    action = 0.01 * jax.random.normal(ka, (F,), dtype=jnp.float32)

    # 1) Default path at tiny size (plain-JAX bypass).
    x_out, cost = recourse_forward(x, action)
    jax.block_until_ready((x_out, cost))
    assert jnp.allclose(x_out, x + action, atol=1e-6), "bypass x+action mismatch"
    assert jnp.allclose(cost, action, atol=1e-6), "bypass cost mismatch"

    # 2) Force the Pallas kernel at the small demo shape.
    x_out_p, cost_p = recourse_forward(x, action, force_pallas=True)
    jax.block_until_ready((x_out_p, cost_p))
    assert jnp.allclose(x_out_p, x + action, atol=1e-6), "pallas x+action mismatch"
    assert jnp.allclose(cost_p, action, atol=1e-6), "pallas cost mismatch"

    # 3) Larger f32 shape exercising the tiled, pipelined, lane-dense path.
    Bl, Fl = 8192, 256
    xl = jax.random.normal(kx2, (Bl, Fl), dtype=jnp.float32)
    al = 0.01 * jnp.arange(Fl, dtype=jnp.float32)
    xl_out, cl = recourse_forward(xl, al)
    jax.block_until_ready((xl_out, cl))
    assert jnp.allclose(xl_out, xl + al, atol=1e-6), "tiled x+action mismatch"
    assert jnp.allclose(cl, al, atol=1e-6), "tiled cost mismatch"

    # 4) Mixed dtype (bf16 x + f32 action): in-kernel cast + row folding
    #    (F=96 -> fold 4 rows -> lane width 384, multiple of 128).
    Bm, Fm = 4096, 96
    xm = jax.random.normal(kx3, (Bm, Fm), dtype=jnp.bfloat16)
    am = 0.01 * jnp.arange(Fm, dtype=jnp.float32)
    xm_out, cm = recourse_forward(xm, am, force_pallas=True)
    jax.block_until_ready((xm_out, cm))
    assert xm_out.dtype == jnp.float32, "promotion dtype mismatch"
    assert jnp.allclose(xm_out, xm.astype(jnp.float32) + am, atol=1e-5), \
        "mixed-dtype x+action mismatch"
    assert jnp.allclose(cm, am, atol=1e-6), "mixed-dtype cost mismatch"

    print("KERNEL_OK")
</pallas_src>

<mosaic_0001>
module attributes {stable_mosaic.version = 11 : i64} {
  func.func @_recourse_add_kernel(%arg0: i32, %arg1: i32, %arg2: memref<2x32xf32, #tpu.memory_space<vmem>>, %arg3: memref<1x32xf32, #tpu.memory_space<vmem>>, %arg4: memref<2x32xf32, #tpu.memory_space<vmem>>) attributes {dimension_semantics = [#tpu.dimension_semantics<parallel>, #tpu.dimension_semantics<parallel>], iteration_bounds = array<i64: 1, 1>, scalar_prefetch = 0 : i64, scratch_operands = 0 : i64, tpu.core_type = #tpu.core_type<tc>, window_params = [{transform_indices = @transform_0, window_bounds = array<i64: 2, 32>}, {transform_indices = @transform_1, window_bounds = array<i64: 1, 32>}, {transform_indices = @transform_2, window_bounds = array<i64: 2, 32>}]} {
    %c0 = arith.constant 0 : index
    %c0_0 = arith.constant 0 : index
    %0 = vector.load %arg2[%c0, %c0_0] : memref<2x32xf32, #tpu.memory_space<vmem>>, vector<2x32xf32>
    %c0_1 = arith.constant 0 : index
    %c0_2 = arith.constant 0 : index
    %1 = vector.load %arg3[%c0_1, %c0_2] : memref<1x32xf32, #tpu.memory_space<vmem>>, vector<1x32xf32>
    %2 = vector.broadcast %1 : vector<1x32xf32> to vector<2x32xf32>
    %3 = arith.addf %0, %2 : vector<2x32xf32>
    %c0_3 = arith.constant 0 : index
    %c0_4 = arith.constant 0 : index
    %4 = vector.load %arg4[%c0_3, %c0_4] : memref<2x32xf32, #tpu.memory_space<vmem>>, vector<2x32xf32>
    tpu.vector_store %arg4[%c0_3, %c0_4], %3 {strides = array<i32>} : memref<2x32xf32, #tpu.memory_space<vmem>>, vector<2x32xf32>,
    return
  }
  func.func @transform_0(%arg0: i32, %arg1: i32) -> (i32, i32) {
    %c0_i32 = arith.constant 0 : i32
    return %arg0, %arg1 : i32, i32
  }
  func.func @transform_1(%arg0: i32, %arg1: i32) -> (i32, i32) {
    %c0_i32 = arith.constant 0 : i32
    %c0_i32_0 = arith.constant 0 : i32
    return %c0_i32, %arg1 : i32, i32
  }
  func.func @transform_2(%arg0: i32, %arg1: i32) -> (i32, i32) {
    %c0_i32 = arith.constant 0 : i32
    return %arg0, %arg1 : i32, i32
  }
}

</mosaic_0001>

<bundles_post_ra>
// kernel: tpu_custom_call.1
= control target key start
LH: loop header
LB: loop body
LE: loop exit
PB: predicated region body
PF: predicated region fallthrough
CT: control target
= control target key end

     0   :  { %7 = vsyncpa [#allocation3], 0  ;;  %s145_s0 = inlined_call_operand.hbm [shape: f32[2,32], index: 0, kind: input, shape index: {}]   ;;  %s146_s1 = inlined_call_operand.vmem [shape: f32[1,32], index: 1, kind: input, shape index: {}]   ;;  %s147_s2 = inlined_call_operand.hbm [shape: f32[2,32], index: 2, kind: output, shape index: {}]  }
   0x1   :  { %8 = vsyncpa [#allocation4], 0  ;;  %s101_s9 = smov [#allocation2]   ;;  %s53_s13 = scalar_lea.hbm %s145_s0, 32 }
   0x2   :  { %s15_s10 = sshll.u32 %s101_s9, 4  ;;  %p54_p0 = scmp.ne.s32.totalorder %s145_s0, %s53_s13  ;;  %s16_s10 = int_to_ptr.vmem [resolvable:$true] %s15_s10 }
   0x3   :  { %p57_p1 = scmp.lt.u32.totalorder %s53_s13, %s145_s0 }
   0x5   :  { %p59_p2 = pnand %p57_p1, %p54_p0 }
   0x7   :  { %62 = shalt.err (!%p59_p2)
}
   0x8   :  { %s63_s18 = scalar_lea.vmem %s16_s10, 32  ;;  %p68_p4 = scmp.lt.s32.totalorder %s16_s10, %s16_s10 }
   0x9   :  { %p64_p3 = scmp.ne.s32.totalorder %s16_s10, %s63_s18  ;;  %p69_p5 = scmp.lt.s32.totalorder %s63_s18, %s63_s18 }
   0xb   :  { %p70_p6 = por %p69_p5, %p68_p4 }
   0xd   :  { %p71_p7 = pnand %p70_p6, %p64_p3 }
   0xf   :  { %74 = shalt.err (!%p71_p7)
}
  0x10   :  { %18 = dma.hbm_to_vmem [thread:$0]  %s145_s0, 32, %s16_s10, [#allocation3]  }
  0x11   :  { %97 = dma.done.wait [#allocation3], 32  }
  0x12   :  { %98 = vsyncadd [#allocation3], 4294967264  ;;  %s102_s21 = smov [#allocation5]   ;;  %v24_v0 = vld [vmem:[#allocation2] sm:$0x3]  ;;  %vm33_vm0 = vcmask 254976  }
  0x13   :  { %s41_s22 = sshll.u32 %s102_s21, 4  ;;  %v50_v1 = vld [vmem:[%s146_s1] ss:$0 sm:$0xff]  ;;  %s42_s22 = int_to_ptr.vmem [resolvable:$true] %s41_s22 }
  0x14   :  { %v32_v2 = vadd.f32 %v50_v1, %v24_v0  ;;  %s75_s25 = scalar_lea.vmem %s42_s22, 32  ;;  %p80_p9 = scmp.lt.s32.totalorder %s42_s22, %s42_s22 }
  0x15   :  { %p76_p8 = scmp.ne.s32.totalorder %s42_s22, %s75_s25  ;;  %p81_p10 = scmp.lt.s32.totalorder %s75_s25, %s75_s25 }
  0x16   :  { %34 = vst.msk [vmem:[#allocation5] sm:$0x3] %vm33_vm0, %v32_v2 }
  0x17   :  { %p82_p11 = por %p81_p10, %p80_p9 }
  0x19   :  { %p83_p12 = pnand %p82_p11, %p76_p8 }
  0x1b   :  { %86 = shalt.err (!%p83_p12)
}
  0x1c   :  { %s87_s27 = scalar_lea.hbm %s147_s2, 32 }
  0x1d   :  { %p88_p13 = scmp.ne.s32.totalorder %s147_s2, %s87_s27  ;;  %p91_p0 = scmp.lt.u32.totalorder %s87_s27, %s147_s2 }
  0x1f   :  { %p93_p1 = pnand %p91_p0, %p88_p13 }
  0x21   :  { %96 = shalt.err (!%p93_p1)
}
  0x22   :  { %44 = dma.vmem_to_hbm [thread:$0]  %s42_s22, 32, %s147_s2, [#allocation4]  }
  0x23   :  { %99 = dma.done.wait [#allocation4], 32  }
  0x24   :  { %100 = vsyncadd [#allocation4], 4294967264 }
  0x25   :  { %48 = vsyncpa [#allocation3], 1 }
  0x26   :  { %49 = vsyncpa [#allocation4], 1 }

</bundles_post_ra>
